<compile_context>
chip_gen: v7x
topology: tpu7x:2x2x1
jax: 0.10.0
libtpu: 0.0.40
codegen_flags: <defaults>
</compile_context>

<pallas_src>
import jax
import jax.numpy as jnp
from jax.experimental import pallas as pl
from jax.experimental.pallas import tpu as pltpu

_EPS = 1e-5  # torch.nn.LayerNorm default


def _valuenet_kernel(x_ref, w1_ref, ln1_ref, w2_ref, ln2w3_ref, b3_ref, o_ref):
    # x_ref:     (TB, in_dim) f32   obs tile (streamed from HBM)
    # w1_ref:    (in_dim, 64) bf16  layer-1 weight (VMEM resident)
    # ln1_ref:   (3, 64)      f32   rows = [b1, gamma1, beta1]
    # w2_ref:    (64, 32)     f32   layer-2 weight
    # ln2w3_ref: (4, 32)      f32   rows = [b2, gamma2, beta2, w3[:, 0]]
    # b3_ref:    (1,)         f32   layer-3 bias (SMEM scalar)
    # o_ref:     (1, TB)      f32   output with batch on the lane axis

    # ---- layer1: bf16 MXU matmul with f32 accumulation, + bias, ReLU ----
    x = x_ref[...].astype(jnp.bfloat16)     # in-kernel cast; obs streamed as f32
    h = jnp.dot(x, w1_ref[...], preferred_element_type=jnp.float32)
    h = jnp.maximum(h + ln1_ref[0:1, :], 0.0)

    # ---- LayerNorm(64), f32 (biased variance, eps inside rsqrt: torch) ----
    m = jnp.mean(h, axis=-1, keepdims=True)
    c = h - m
    v = jnp.mean(c * c, axis=-1, keepdims=True)
    h = c * jax.lax.rsqrt(v + _EPS) * ln1_ref[1:2, :] + ln1_ref[2:3, :]

    # ---- layer2 + ReLU (f32 path; FLOPs here are negligible) ----
    h = jnp.dot(h, w2_ref[...], preferred_element_type=jnp.float32)
    h = jnp.maximum(h + ln2w3_ref[0:1, :], 0.0)

    # ---- LayerNorm(32) ----
    m = jnp.mean(h, axis=-1, keepdims=True)
    c = h - m
    v = jnp.mean(c * c, axis=-1, keepdims=True)
    h = c * jax.lax.rsqrt(v + _EPS) * ln2w3_ref[1:2, :] + ln2w3_ref[2:3, :]

    # ---- layer3 (32 -> 1): contract h's feature axis directly so the result
    # is produced as (1, TB) (batch on lanes) WITHOUT materializing h.T.
    w3_row = ln2w3_ref[3:4, :]                                    # (1, 32)
    val = jax.lax.dot_general(
        w3_row, h,
        dimension_numbers=(((1,), (1,)), ((), ())),
        preferred_element_type=jnp.float32)                       # (1, TB)
    val = jnp.maximum(val + b3_ref[0], 0.0)
    o_ref[...] = val.astype(o_ref.dtype)


def init_params(in_dim, key=None):
    """Deterministic synthetic parameters matching the module's shapes."""
    if key is None:
        key = jax.random.PRNGKey(0)
    ks = jax.random.split(key, 6)
    return {
        "w1": jax.random.normal(ks[0], (in_dim, 64), jnp.float32) * 0.1,
        "b1": jax.random.normal(ks[1], (64,), jnp.float32) * 0.01,
        "g1": jnp.ones((64,), jnp.float32),
        "be1": jnp.zeros((64,), jnp.float32),
        "w2": jax.random.normal(ks[2], (64, 32), jnp.float32) * 0.1,
        "b2": jax.random.normal(ks[3], (32,), jnp.float32) * 0.01,
        "g2": jnp.ones((32,), jnp.float32),
        "be2": jnp.zeros((32,), jnp.float32),
        "w3": jax.random.normal(ks[4], (32, 1), jnp.float32) * 0.1,
        "b3": jax.random.normal(ks[5], (1,), jnp.float32) * 0.01,
    }


def _round_up(x, m):
    return ((x + m - 1) // m) * m


def _vmem_budgets():
    """(vmem_limit_bytes for the kernel, VMEM budget used to size the tile)."""
    try:
        cap = int(pltpu.get_tpu_info().vmem_capacity_bytes)
    except Exception:
        cap = 64 << 20   # conservative (v7x-sized); safe on every generation
    vmem_limit = min((cap * 3) // 4, 100 << 20)   # ~48 MiB v7x, ~96 MiB v5e/v6e
    return vmem_limit, vmem_limit // 2


def _choose_tiling(B, in_dim, tile_budget_bytes):
    """Pick (TB, B_pad, grid).

    TB is the largest VMEM-affordable batch tile (multiple of 128 for a
    lane-dense output, capped at 8192); the grid is kept even (>= 2) whenever
    the batch allows so dimension_semantics=("parallel",) can shard tiles
    across v7x's two TensorCores.  Padding is bounded to ~one lane-tile per
    grid step instead of up to a whole TB.
    """
    # Per-row VMEM bytes: f32 obs double buffer + in-kernel bf16 copy +
    # f32 activations / LayerNorm temporaries + (1, TB) output double buffer.
    per_row = 8 * in_dim + 2 * in_dim + 4 * 3 * (64 + 32) + 8
    cap = (tile_budget_bytes // per_row) // 128 * 128
    cap = max(512, min(cap, 8192))
    b128 = _round_up(max(B, 1), 128)
    n = -(-b128 // cap)                 # number of tiles (ceil)
    if n == 1 and b128 >= 256:
        n = 2                           # give both v7x TensorCores a tile
    if n > 1 and n % 2:
        n += 1                          # even grid -> clean 2-TC sharding
    tb = _round_up(-(-b128 // n), 128)
    return tb, tb * n, n


def value_net_forward(obs, params, batch_tile=None):
    obs = jnp.asarray(obs, jnp.float32)
    B, in_dim = obs.shape

    vmem_limit, tile_budget = _vmem_budgets()
    if batch_tile is None:
        TB, B_pad, grid = _choose_tiling(B, in_dim, tile_budget)
    else:
        TB = batch_tile
        B_pad = _round_up(B, TB)
        grid = B_pad // TB

    # Stream obs in f32 (no wrapper-side bf16 cast — that is an extra un-fused
    # HBM read+write pass over obs).  Pad once (zeros) only if ragged; padded
    # rows flow harmlessly through the LayerNorms (eps keeps rsqrt finite) and
    # are sliced off afterwards.
    obs_p = obs if B_pad == B else jnp.pad(obs, ((0, B_pad - B), (0, 0)))

    # Parameters: w1 in bf16 (tiny, one-time cast); the remaining small tensors
    # consolidated into two VMEM slabs + one SMEM scalar so they are DMA'd once
    # (constant index_map) instead of many per-step transfers.
    w1 = params["w1"].astype(jnp.bfloat16)
    ln1 = jnp.stack([params["b1"], params["g1"], params["be1"]], axis=0)    # (3, 64)
    ln2w3 = jnp.stack([params["b2"], params["g2"], params["be2"],
                       params["w3"][:, 0]], axis=0)                         # (4, 32)
    b3 = params["b3"].reshape((1,)).astype(jnp.float32)

    # TODO(synk): single-buffer the constant parameter inputs via
    # pipeline_mode=pl.Buffered(1) once verified on this JAX build; with a
    # constant index_map they are fetched once but still reserve a second
    # buffer (only matters for very large in_dim on v7x's 64 MiB VMEM).
    const = lambda shape: pl.BlockSpec(shape, lambda i: (0, 0))  # VMEM-resident

    out = pl.pallas_call(
        _valuenet_kernel,
        out_shape=jax.ShapeDtypeStruct((1, B_pad), jnp.float32),
        grid_spec=pltpu.PrefetchScalarGridSpec(
            num_scalar_prefetch=0,
            grid=(grid,),
            in_specs=[
                pl.BlockSpec((TB, in_dim), lambda i: (i, 0)),        # obs tile (f32)
                const((in_dim, 64)),                                 # w1 (bf16)
                const((3, 64)),                                      # b1/g1/be1
                const((64, 32)),                                     # w2
                const((4, 32)),                                      # b2/g2/be2/w3
                pl.BlockSpec(memory_space=pltpu.MemorySpace.SMEM),   # b3 scalar
            ],
            out_specs=pl.BlockSpec((1, TB), lambda i: (0, i)),       # lane-dense
        ),
        compiler_params=pltpu.CompilerParams(
            dimension_semantics=("parallel",),
            vmem_limit_bytes=int(vmem_limit)),
    )(obs_p, w1, ln1, params["w2"], ln2w3, b3)

    # (1, B_pad) -> (B, 1)
    return out.reshape(-1)[:B].reshape(B, 1)


def _reference_forward(obs, p):
    """Pure-JAX reference mirroring the PyTorch forward, with the same bf16
    rounding applied to obs / w1 as the kernel's layer-1 MXU path."""
    hp = jax.lax.Precision.HIGHEST
    x = obs.astype(jnp.bfloat16).astype(jnp.float32)
    w1 = p["w1"].astype(jnp.bfloat16).astype(jnp.float32)
    x = jnp.maximum(jnp.dot(x, w1, precision=hp) + p["b1"], 0.0)
    m = x.mean(-1, keepdims=True)
    v = ((x - m) ** 2).mean(-1, keepdims=True)
    x = (x - m) / jnp.sqrt(v + _EPS) * p["g1"] + p["be1"]
    x = jnp.maximum(jnp.dot(x, p["w2"], precision=hp) + p["b2"], 0.0)
    m = x.mean(-1, keepdims=True)
    v = ((x - m) ** 2).mean(-1, keepdims=True)
    x = (x - m) / jnp.sqrt(v + _EPS) * p["g2"] + p["be2"]
    x = jnp.maximum(jnp.dot(x, p["w3"], precision=hp) + p["b3"], 0.0)
    return x


if __name__ == "__main__":
    key = jax.random.PRNGKey(0)
    k_obs, k_par = jax.random.split(key)

    batch, in_dim = 8, 32
    obs = jax.random.normal(k_obs, (batch, in_dim), jnp.float32)
    params = init_params(in_dim, k_par)

    out = jax.block_until_ready(value_net_forward(obs, params))
    ref = _reference_forward(obs, params)

    assert out.shape == (batch, 1), out.shape
    assert jnp.allclose(out, ref, atol=2e-3, rtol=2e-3), (out, ref)

    print("KERNEL_OK")
</pallas_src>

<mosaic_0001>
module attributes {stable_mosaic.version = 11 : i64} {
  func.func @_valuenet_kernel(%arg0: i32, %arg1: memref<128x32xf32, #tpu.memory_space<vmem>>, %arg2: memref<32x64xbf16, #tpu.memory_space<vmem>>, %arg3: memref<3x64xf32, #tpu.memory_space<vmem>>, %arg4: memref<64x32xf32, #tpu.memory_space<vmem>>, %arg5: memref<4x32xf32, #tpu.memory_space<vmem>>, %arg6: memref<1xf32, #tpu.memory_space<smem>>, %arg7: memref<1x128xf32, #tpu.memory_space<vmem>>) attributes {dimension_semantics = [#tpu.dimension_semantics<parallel>], iteration_bounds = array<i64: 1>, scalar_prefetch = 0 : i64, scratch_operands = 0 : i64, tpu.core_type = #tpu.core_type<tc>, window_params = [{transform_indices = @transform_0, window_bounds = array<i64: 128, 32>}, {pipeline_mode = #tpu.pipeline_mode<synchronous>, transform_indices = @transform_1, window_bounds = array<i64: 32, 64>}, {pipeline_mode = #tpu.pipeline_mode<synchronous>, transform_indices = @transform_2, window_bounds = array<i64: 3, 64>}, {pipeline_mode = #tpu.pipeline_mode<synchronous>, transform_indices = @transform_3, window_bounds = array<i64: 64, 32>}, {pipeline_mode = #tpu.pipeline_mode<synchronous>, transform_indices = @transform_4, window_bounds = array<i64: 4, 32>}, {transform_indices = @transform_5, window_bounds = array<i64: 1>}, {transform_indices = @transform_6, window_bounds = array<i64: 1, 128>}]} {
    %c0 = arith.constant 0 : index
    %c0_0 = arith.constant 0 : index
    %0 = vector.load %arg1[%c0, %c0_0] : memref<128x32xf32, #tpu.memory_space<vmem>>, vector<128x32xf32>
    %1 = arith.truncf %0 : vector<128x32xf32> to vector<128x32xbf16>
    %c0_1 = arith.constant 0 : index
    %c0_2 = arith.constant 0 : index
    %2 = vector.load %arg2[%c0_1, %c0_2] : memref<32x64xbf16, #tpu.memory_space<vmem>>, vector<32x64xbf16>
    %cst = arith.constant dense<0.000000e+00> : vector<128x64xf32>
    %3 = tpu.matmul %1, %2, %cst {dimension_numbers = #tpu.dot_dimension_numbers<[1], [0], [0], [1], [0, 0, 1, 1], [], []>} : vector<128x32xbf16>, vector<32x64xbf16>, vector<128x64xf32> -> vector<128x64xf32>
    %c0_3 = arith.constant 0 : index
    %c0_4 = arith.constant 0 : index
    %4 = vector.load %arg3[%c0_3, %c0_4] : memref<3x64xf32, #tpu.memory_space<vmem>>, vector<1x64xf32>
    %5 = vector.broadcast %4 : vector<1x64xf32> to vector<128x64xf32>
    %6 = arith.addf %3, %5 : vector<128x64xf32>
    %cst_5 = arith.constant 0.000000e+00 : f32
    %7 = vector.broadcast %cst_5 : f32 to vector<128x64xf32>
    %8 = arith.maximumf %6, %7 : vector<128x64xf32>
    %cst_6 = arith.constant dense<0.000000e+00> : vector<128xf32>
    %9 = vector.multi_reduction <add>, %8, %cst_6 [1] : vector<128x64xf32> to vector<128xf32>
    %10 = vector.shape_cast %9 : vector<128xf32> to vector<128x1xf32>
    %cst_7 = arith.constant 6.400000e+01 : f32
    %11 = vector.broadcast %cst_7 : f32 to vector<128x1xf32>
    %12 = arith.divf %10, %11 : vector<128x1xf32>
    %13 = vector.broadcast %12 : vector<128x1xf32> to vector<128x64xf32>
    %14 = arith.subf %8, %13 : vector<128x64xf32>
    %15 = arith.mulf %14, %14 : vector<128x64xf32>
    %cst_8 = arith.constant dense<0.000000e+00> : vector<128xf32>
    %16 = vector.multi_reduction <add>, %15, %cst_8 [1] : vector<128x64xf32> to vector<128xf32>
    %17 = vector.shape_cast %16 : vector<128xf32> to vector<128x1xf32>
    %cst_9 = arith.constant 6.400000e+01 : f32
    %18 = vector.broadcast %cst_9 : f32 to vector<128x1xf32>
    %19 = arith.divf %17, %18 : vector<128x1xf32>
    %cst_10 = arith.constant 9.99999974E-6 : f32
    %20 = vector.broadcast %cst_10 : f32 to vector<128x1xf32>
    %21 = arith.addf %19, %20 : vector<128x1xf32>
    %22 = math.rsqrt %21 : vector<128x1xf32>
    %23 = vector.broadcast %22 : vector<128x1xf32> to vector<128x64xf32>
    %24 = arith.mulf %14, %23 : vector<128x64xf32>
    %c1 = arith.constant 1 : index
    %c0_11 = arith.constant 0 : index
    %25 = vector.load %arg3[%c1, %c0_11] : memref<3x64xf32, #tpu.memory_space<vmem>>, vector<1x64xf32>
    %26 = vector.broadcast %25 : vector<1x64xf32> to vector<128x64xf32>
    %27 = arith.mulf %24, %26 : vector<128x64xf32>
    %c2 = arith.constant 2 : index
    %c0_12 = arith.constant 0 : index
    %28 = vector.load %arg3[%c2, %c0_12] : memref<3x64xf32, #tpu.memory_space<vmem>>, vector<1x64xf32>
    %29 = vector.broadcast %28 : vector<1x64xf32> to vector<128x64xf32>
    %30 = arith.addf %27, %29 : vector<128x64xf32>
    %c0_13 = arith.constant 0 : index
    %c0_14 = arith.constant 0 : index
    %31 = vector.load %arg4[%c0_13, %c0_14] : memref<64x32xf32, #tpu.memory_space<vmem>>, vector<64x32xf32>
    %cst_15 = arith.constant dense<0.000000e+00> : vector<128x32xf32>
    %32 = tpu.matmul %30, %31, %cst_15 {dimension_numbers = #tpu.dot_dimension_numbers<[1], [0], [0], [1], [0, 0, 1, 1], [], []>} : vector<128x64xf32>, vector<64x32xf32>, vector<128x32xf32> -> vector<128x32xf32>
    %c0_16 = arith.constant 0 : index
    %c0_17 = arith.constant 0 : index
    %33 = vector.load %arg5[%c0_16, %c0_17] : memref<4x32xf32, #tpu.memory_space<vmem>>, vector<1x32xf32>
    %34 = vector.broadcast %33 : vector<1x32xf32> to vector<128x32xf32>
    %35 = arith.addf %32, %34 : vector<128x32xf32>
    %cst_18 = arith.constant 0.000000e+00 : f32
    %36 = vector.broadcast %cst_18 : f32 to vector<128x32xf32>
    %37 = arith.maximumf %35, %36 : vector<128x32xf32>
    %cst_19 = arith.constant dense<0.000000e+00> : vector<128xf32>
    %38 = vector.multi_reduction <add>, %37, %cst_19 [1] : vector<128x32xf32> to vector<128xf32>
    %39 = vector.shape_cast %38 : vector<128xf32> to vector<128x1xf32>
    %cst_20 = arith.constant 3.200000e+01 : f32
    %40 = vector.broadcast %cst_20 : f32 to vector<128x1xf32>
    %41 = arith.divf %39, %40 : vector<128x1xf32>
    %42 = vector.broadcast %41 : vector<128x1xf32> to vector<128x32xf32>
    %43 = arith.subf %37, %42 : vector<128x32xf32>
    %44 = arith.mulf %43, %43 : vector<128x32xf32>
    %cst_21 = arith.constant dense<0.000000e+00> : vector<128xf32>
    %45 = vector.multi_reduction <add>, %44, %cst_21 [1] : vector<128x32xf32> to vector<128xf32>
    %46 = vector.shape_cast %45 : vector<128xf32> to vector<128x1xf32>
    %cst_22 = arith.constant 3.200000e+01 : f32
    %47 = vector.broadcast %cst_22 : f32 to vector<128x1xf32>
    %48 = arith.divf %46, %47 : vector<128x1xf32>
    %cst_23 = arith.constant 9.99999974E-6 : f32
    %49 = vector.broadcast %cst_23 : f32 to vector<128x1xf32>
    %50 = arith.addf %48, %49 : vector<128x1xf32>
    %51 = math.rsqrt %50 : vector<128x1xf32>
    %52 = vector.broadcast %51 : vector<128x1xf32> to vector<128x32xf32>
    %53 = arith.mulf %43, %52 : vector<128x32xf32>
    %c1_24 = arith.constant 1 : index
    %c0_25 = arith.constant 0 : index
    %54 = vector.load %arg5[%c1_24, %c0_25] : memref<4x32xf32, #tpu.memory_space<vmem>>, vector<1x32xf32>
    %55 = vector.broadcast %54 : vector<1x32xf32> to vector<128x32xf32>
    %56 = arith.mulf %53, %55 : vector<128x32xf32>
    %c2_26 = arith.constant 2 : index
    %c0_27 = arith.constant 0 : index
    %57 = vector.load %arg5[%c2_26, %c0_27] : memref<4x32xf32, #tpu.memory_space<vmem>>, vector<1x32xf32>
    %58 = vector.broadcast %57 : vector<1x32xf32> to vector<128x32xf32>
    %59 = arith.addf %56, %58 : vector<128x32xf32>
    %c3 = arith.constant 3 : index
    %c0_28 = arith.constant 0 : index
    %60 = vector.load %arg5[%c3, %c0_28] : memref<4x32xf32, #tpu.memory_space<vmem>>, vector<1x32xf32>
    %cst_29 = arith.constant dense<0.000000e+00> : vector<1x128xf32>
    %61 = tpu.matmul %60, %59, %cst_29 {dimension_numbers = #tpu.dot_dimension_numbers<[1], [1], [0], [0], [0, 0, 1, 0], [], []>} : vector<1x32xf32>, vector<128x32xf32>, vector<1x128xf32> -> vector<1x128xf32>
    %c0_30 = arith.constant 0 : index
    %62 = memref.load %arg6[%c0_30] : memref<1xf32, #tpu.memory_space<smem>>
    %63 = vector.broadcast %62 : f32 to vector<1x128xf32>
    %64 = arith.addf %61, %63 : vector<1x128xf32>
    %cst_31 = arith.constant 0.000000e+00 : f32
    %65 = vector.broadcast %cst_31 : f32 to vector<1x128xf32>
    %66 = arith.maximumf %64, %65 : vector<1x128xf32>
    %c0_32 = arith.constant 0 : index
    %c0_33 = arith.constant 0 : index
    %67 = vector.load %arg7[%c0_32, %c0_33] : memref<1x128xf32, #tpu.memory_space<vmem>>, vector<1x128xf32>
    tpu.vector_store %arg7[%c0_32, %c0_33], %66 {strides = array<i32>} : memref<1x128xf32, #tpu.memory_space<vmem>>, vector<1x128xf32>,
    return
  }
  func.func @transform_0(%arg0: i32) -> (i32, i32) {
    %c0_i32 = arith.constant 0 : i32
    %c0_i32_0 = arith.constant 0 : i32
    return %arg0, %c0_i32 : i32, i32
  }
  func.func @transform_1(%arg0: i32) -> (i32, i32) {
    %c0_i32 = arith.constant 0 : i32
    %c0_i32_0 = arith.constant 0 : i32
    %c0_i32_1 = arith.constant 0 : i32
    return %c0_i32, %c0_i32_0 : i32, i32
  }
  func.func @transform_2(%arg0: i32) -> (i32, i32) {
    %c0_i32 = arith.constant 0 : i32
    %c0_i32_0 = arith.constant 0 : i32
    %c0_i32_1 = arith.constant 0 : i32
    return %c0_i32, %c0_i32_0 : i32, i32
  }
  func.func @transform_3(%arg0: i32) -> (i32, i32) {
    %c0_i32 = arith.constant 0 : i32
    %c0_i32_0 = arith.constant 0 : i32
    %c0_i32_1 = arith.constant 0 : i32
    return %c0_i32, %c0_i32_0 : i32, i32
  }
  func.func @transform_4(%arg0: i32) -> (i32, i32) {
    %c0_i32 = arith.constant 0 : i32
    %c0_i32_0 = arith.constant 0 : i32
    %c0_i32_1 = arith.constant 0 : i32
    return %c0_i32, %c0_i32_0 : i32, i32
  }
  func.func @transform_5(%arg0: i32) -> i32 {
    %c0_i32 = arith.constant 0 : i32
    %c0_i32_0 = arith.constant 0 : i32
    return %c0_i32 : i32
  }
  func.func @transform_6(%arg0: i32) -> (i32, i32) {
    %c0_i32 = arith.constant 0 : i32
    %c0_i32_0 = arith.constant 0 : i32
    return %c0_i32, %arg0 : i32, i32
  }
}

</mosaic_0001>

<bundles_post_ra>
// kernel: tpu_custom_call.1
= control target key start
LH: loop header
LB: loop body
LE: loop exit
PB: predicated region body
PF: predicated region fallthrough
CT: control target
= control target key end

     0   :  { %vm71_vm0 = vcmask 261120   ;;  %s2175_s0 = inlined_call_operand.vmem [shape: f32[128,32], index: 0, kind: input, shape index: {}]   ;;  %s2176_s1 = inlined_call_operand.vmem [shape: bf16[32,64], index: 1, kind: input, shape index: {}]   ;;  %s2177_s2 = inlined_call_operand.vmem [shape: f32[3,64], index: 2, kind: input, shape index: {}]   ;;  %s2178_s3 = inlined_call_operand.vmem [shape: f32[64,32], index: 3, kind: input, shape index: {}]   ;;  %s2179_s4 = inlined_call_operand.vmem [shape: f32[4,32], index: 4, kind: input, shape index: {}]   ;;  %s2180_s5 = inlined_call_operand.<no memory space> [shape: f32[1], index: 5, kind: input, shape index: {}]   ;;  %s2181_s6 = inlined_call_operand.hbm [shape: f32[1,128], index: 6, kind: output, shape index: {}]  }
   0x1   :  { %v1321_v0 = vld [vmem:[%s2176_s1] sm:$0xff]   ;;  %v1322_v1 = vld [vmem:[%s2176_s1 + $0x8] sm:$0xff]   ;;  %v28_v5 = vld [vmem:[%s2175_s0 + $0x10] sm:$0xff] }
   0x2   :  { %1174 = vmatprep.subr.bf16.mxu1 %v1321_v0  ;;  %v26_v2 = vld [vmem:[%s2175_s0] sm:$0xff]  ;;  %v27_v3 = vld [vmem:[%s2175_s0 + $0x8] sm:$0xff]  ;;  %v29_v6 = vld [vmem:[%s2175_s0 + $0x18] sm:$0xff] }
   0x3   :  { %1175 = vmatpush3.bf16.msra.mxu1 %v1321_v0  ;;  %v42_v4 = vpack.c.bf16 %v27_v3, %v26_v2  ;;  %v30_v7 = vld [vmem:[%s2175_s0 + $0x20] sm:$0xff]  ;;  %v31_v8 = vld [vmem:[%s2175_s0 + $0x28] sm:$0xff]  ;;  %v43_v9 = vpack.c.bf16 %v29_v6, %v28_v5 }
   0x4   :  { %1176 = vmatprep.subr.bf16.mxu1 %v1322_v1  ;;  %v44_v10 = vpack.c.bf16 %v31_v8, %v30_v7 }
   0x5   :  { %1178 = vmatprep.mubr.msk.bf16.mxu1 %vm71_vm0, %v42_v4 }
   0x7   :  { %1177 = vmatpush3.bf16.msra.mxu1 %v1322_v1 }
   0x8   :  { %12 = vsyncpa [#allocation4], 0  ;;  %v32_v11 = vld [vmem:[%s2175_s0 + $0x30] sm:$0xff]  ;;  %v33_v12 = vld [vmem:[%s2175_s0 + $0x38] sm:$0xff]  ;;  %vm209_vm1 = vcmask 523264   ;;  %vm1412_vm2 = vmmov 0  }
   0x9   :  { %v34_v13 = vld [vmem:[%s2175_s0 + $0x40] sm:$0xff]  ;;  %v35_v14 = vld [vmem:[%s2175_s0 + $0x48] sm:$0xff]  ;;  %v45_v15 = vpack.c.bf16 %v33_v12, %v32_v11  ;;  %v36_v17 = vld [vmem:[%s2175_s0 + $0x50] sm:$0xff]  ;;  %s1414_s10 = smov [#allocation3]  }
   0xa   :  { %1179 = vmatmul.mubr.msk.bf16.vlgmr.msra.gmra.mrb[0].mxu1 %vm71_vm0, %v43_v9  ;;  %v46_v16 = vpack.c.bf16 %v35_v14, %v34_v13  ;;  %v37_v18 = vld [vmem:[%s2175_s0 + $0x58] sm:$0xff]  ;;  %v38_v19 = vld [vmem:[%s2175_s0 + $0x60] sm:$0xff]  ;;  %v39_v20 = vld [vmem:[%s2175_s0 + $0x68] sm:$0xff]  ;;  %s1066_s11 = sshll.u32 %s1414_s10, 4  ;;  %s1067_s11 = int_to_ptr.vmem [resolvable:$true] %s1066_s11 }
   0xb   :  { %1182 = vmatprep.mubr.msk.bf16.mxu1 %vm71_vm0, %v44_v10  ;;  %v47_v21 = vpack.c.bf16 %v37_v18, %v36_v17  ;;  %v48_v22 = vpack.c.bf16 %v39_v20, %v38_v19  ;;  %v40_v23 = vld [vmem:[%s2175_s0 + $0x70] sm:$0xff]  ;;  %v41_v24 = vld [vmem:[%s2175_s0 + $0x78] sm:$0xff]  ;;  %v1515_v26 = vld [vmem:[%s2177_s2] ss:$0 sm:$0xff]  ;;  %s1387_s12 = scalar_lea.vmem %s1067_s11, 16  ;;  %s1391_s13 = scalar_lea.vmem %s1067_s11, 32 }
   0xc   :  { %v49_v25 = vpack.c.bf16 %v41_v24, %v40_v23  ;;  %vm2089_vm3 = vmpackc.low %vm71_vm0, %vm71_vm0  ;;  %p1388_p0 = scmp.ne.s32.totalorder %s1067_s11, %s1387_s12  ;;  %p1392_p1 = scmp.lt.s32.totalorder %s1067_s11, %s1067_s11 }
   0xd   :  { %p1393_p2 = scmp.lt.s32.totalorder %s1391_s13, %s1387_s12 }
   0xf   :  { %p1394_p3 = por %p1393_p2, %p1392_p1 }
  0x11   :  { %p1395_p4 = pnand %p1394_p3, %p1388_p0 }
  0x12   :  { %1183 = vmatmul.mubr.msk.bf16.gmra.mrb[4].mxu1 %vm71_vm0, %v45_v15 }
  0x13   :  { %1186 = vmatprep.mubr.msk.bf16.mxu1 %vm71_vm0, %v46_v16 }
  0x1a   :  { %1187 = vmatmul.mubr.msk.bf16.gmra.mrb[8].mxu1 %vm71_vm0, %v47_v21 }
  0x1b   :  { %1190 = vmatprep.mubr.msk.bf16.mxu1 %vm71_vm0, %v48_v22 }
  0x22   :  { %1191 = vmatmul.mubr.msk.bf16.gmra.mrb[12].mxu1 %vm71_vm0, %v49_v25 }
  0xdd   :  { %v1180_v27 = vpop.f32.mrb[0].mxu1 }
  0xde   :  { %v1518_v28 = vadd.f32 %v1180_v27, %v1515_v26  ;;  %v130_v29 = vpop.f32.mrb[1].mxu1  ;;  %v461_v27 = vld [vmem:[%s2178_s3] sm:$0xff] }
  0xdf   :  { %v1521_v30 = vadd.f32 %v1515_v26, %v130_v29  ;;  %v1181_v31 = vpop.f32.mrb[2].mxu1  ;;  %v462_v29 = vld [vmem:[%s2178_s3 + $0x8] sm:$0xff] }
  0xe0   :  { %v195_v32 = vmax.f32 %v1518_v28, 0.0  ;;  %v1525_v33 = vadd.f32 %v1181_v31, %v1515_v26  ;;  %v133_v34 = vpop.f32.mrb[3].mxu1  ;;  %v1269_v31 = vpack.c.bf16 %v462_v29, %v461_v27 }
  0xe1   :  { %v193_v35 = vmax.f32 %v1521_v30, 0.0  ;;  %v1529_v36 = vadd.f32 %v1515_v26, %v133_v34 }
  0xe2   :  { %v196_v37 = vmax.f32 %v1525_v33, 0.0  ;;  %v216_v38 = vsel %vm209_vm1, %v195_v32, 0.0  ;;  %1270 = vmatprep.subr.bf16.mxu1 %v1269_v31 }
  0xe3   :  { %v194_v39 = vmax.f32 %v1529_v36, 0.0  ;;  %217 = vadd.xlane.f32.xlu1 %v216_v38  ;;  %v210_v40 = vsel %vm209_vm1, %v193_v35, 0.0  ;;  %1272 = vmatpush3.bf16.msra.mxu1 %v1269_v31 }
  0xe4   :  { %211 = vadd.xlane.f32.xlu0 %v210_v40  ;;  %v219_v44 = vsel %vm209_vm1, %v196_v37, 0.0 }
  0xe5   :  { %v1184_v41 = vpop.f32.mrb[4].mxu1  ;;  %v213_v47 = vsel %vm209_vm1, %v194_v39, 0.0 }
  0xe6   :  { %v1540_v42 = vadd.f32 %v1184_v41, %v1515_v26  ;;  %v146_v43 = vpop.f32.mrb[5].mxu1 }
  0xe7   :  { %v1546_v45 = vadd.f32 %v1515_v26, %v146_v43  ;;  %220 = vadd.xlane.f32.xlu1 %v219_v44  ;;  %v1185_v46 = vpop.f32.mrb[6].mxu1 }
  0xe8   :  { %v1552_v48 = vadd.f32 %v1185_v46, %v1515_v26  ;;  %v149_v49 = vpop.f32.mrb[7].mxu1  ;;  %214 = vadd.xlane.f32.xlu0 %v213_v47  ;;  %v199_v50 = vmax.f32 %v1540_v42, 0.0 }
  0xe9   :  { %v197_v51 = vmax.f32 %v1546_v45, 0.0  ;;  %v1557_v52 = vadd.f32 %v1515_v26, %v149_v49 }
  0xea   :  { %v200_v53 = vmax.f32 %v1552_v48, 0.0  ;;  %v228_v58 = vsel %vm209_vm1, %v199_v50, 0.0 }
  0xeb   :  { %v198_v54 = vmax.f32 %v1557_v52, 0.0  ;;  %v222_v55 = vsel %vm209_vm1, %v197_v51, 0.0 }
  0xec   :  { %223 = vadd.xlane.f32.xlu0 %v222_v55  ;;  %v231_v63 = vsel %vm209_vm1, %v200_v53, 0.0 }
  0xed   :  { %v1188_v56 = vpop.f32.mrb[8].mxu1  ;;  %v225_v57 = vsel %vm209_vm1, %v198_v54, 0.0 }
  0xee   :  { %v1571_v59 = vadd.f32 %v1188_v56, %v1515_v26  ;;  %v162_v60 = vpop.f32.mrb[9].mxu1  ;;  %226 = vadd.xlane.f32.xlu1 %v225_v57 }
  0xef   :  { %v1574_v61 = vadd.f32 %v1515_v26, %v162_v60  ;;  %v1189_v62 = vpop.f32.mrb[10].mxu1 }
  0xf0   :  { %v1580_v0 = vadd.f32 %v1189_v62, %v1515_v26  ;;  %v165_v1 = vpop.f32.mrb[11].mxu1  ;;  %229 = vadd.xlane.f32.xlu0 %v228_v58  ;;  %v203_v2 = vmax.f32 %v1571_v59, 0.0 }
  0xf1   :  { %v201_v3 = vmax.f32 %v1574_v61, 0.0  ;;  %v1585_v4 = vadd.f32 %v1515_v26, %v165_v1 }
  0xf2   :  { %232 = vadd.xlane.f32.xlu1 %v231_v63  ;;  %v204_v5 = vmax.f32 %v1580_v0, 0.0  ;;  %v240_v10 = vsel %vm209_vm1, %v203_v2, 0.0 }
  0xf3   :  { %v202_v6 = vmax.f32 %v1585_v4, 0.0  ;;  %v234_v7 = vsel %vm209_vm1, %v201_v3, 0.0 }
  0xf4   :  { %235 = vadd.xlane.f32.xlu0 %v234_v7  ;;  %v243_v15 = vsel %vm209_vm1, %v204_v5, 0.0 }
  0xf5   :  { %v1192_v8 = vpop.f32.mrb[12].mxu1  ;;  %v237_v9 = vsel %vm209_vm1, %v202_v6, 0.0 }
  0xf6   :  { %v1599_v11 = vadd.f32 %v1192_v8, %v1515_v26  ;;  %v178_v12 = vpop.f32.mrb[13].mxu1  ;;  %238 = vadd.xlane.f32.xlu1 %v237_v9 }
  0xf7   :  { %v1602_v13 = vadd.f32 %v1515_v26, %v178_v12  ;;  %v1193_v14 = vpop.f32.mrb[14].mxu1 }
  0xf8   :  { %v1608_v16 = vadd.f32 %v1193_v14, %v1515_v26  ;;  %v181_v17 = vpop.f32.mrb[15].mxu1  ;;  %241 = vadd.xlane.f32.xlu0 %v240_v10  ;;  %v207_v18 = vmax.f32 %v1599_v11, 0.0 }
  0xf9   :  { %v205_v19 = vmax.f32 %v1602_v13, 0.0  ;;  %v1613_v20 = vadd.f32 %v1515_v26, %v181_v17 }
  0xfa   :  { %244 = vadd.xlane.f32.xlu1 %v243_v15  ;;  %v208_v21 = vmax.f32 %v1608_v16, 0.0  ;;  %v252_v25 = vsel %vm209_vm1, %v207_v18, 0.0  ;;  %v466_v16 = vld [vmem:[%s2178_s3 + $0x28] sm:$0xff] }
  0xfb   :  { %v206_v22 = vmax.f32 %v1613_v20, 0.0  ;;  %v246_v23 = vsel %vm209_vm1, %v205_v19, 0.0 }
  0xfc   :  { %247 = vadd.xlane.f32.xlu0 %v246_v23  ;;  %v255_v26 = vsel %vm209_vm1, %v208_v21, 0.0 }
  0xfd   :  { %v249_v24 = vsel %vm209_vm1, %v206_v22, 0.0 }
  0xfe   :  { %250 = vadd.xlane.f32.xlu1 %v249_v24 }
 0x100   :  { %253 = vadd.xlane.f32.xlu0 %v252_v25 }
 0x102   :  { %256 = vadd.xlane.f32.xlu1 %v255_v26 }
 0x170   :  { %v218_v34 = vpop.xlane.xlu1 %217 }
 0x171   :  { %v261_v38 = vmul.f32 0.015625, %v218_v34  ;;  %v212_v40 = vpop.xlane.xlu0 %211 }
 0x172   :  { %v259_v41 = vmul.f32 0.015625, %v212_v40 }
 0x173   :  { %v1637_v43 = vsub.f32 %v195_v32, %v261_v38 }
 0x174   :  { %v1641_v44 = vsub.f32 %v193_v35, %v259_v41  ;;  %v221_v46 = vpop.xlane.xlu1 %220 }
 0x175   :  { %v262_v47 = vmul.f32 0.015625, %v221_v46  ;;  %v215_v49 = vpop.xlane.xlu0 %214  ;;  %v293_v30 = vmul.f32 %v1637_v43, %v1637_v43 }
 0x176   :  { %v260_v55 = vmul.f32 0.015625, %v215_v49  ;;  %v291_v56 = vmul.f32 %v1641_v44, %v1641_v44  ;;  %v463_v49 = vld [vmem:[%s2178_s3 + $0x10] sm:$0xff] }
 0x177   :  { %v1647_v57 = vsub.f32 %v196_v37, %v262_v47 }
 0x178   :  { %v1651_v28 = vsub.f32 %v194_v39, %v260_v55  ;;  %v307_v32 = vsel %vm209_vm1, %v291_v56, 0.0  ;;  %v313_v39 = vsel %vm209_vm1, %v293_v30, 0.0  ;;  %v464_v55 = vld [vmem:[%s2178_s3 + $0x18] sm:$0xff] }
 0x179   :  { %308 = vadd.xlane.f32.xlu0 %v307_v32  ;;  %v224_v35 = vpop.xlane.xlu0 %223  ;;  %v294_v33 = vmul.f32 %v1647_v57, %v1647_v57 }
 0x17a   :  { %v263_v58 = vmul.f32 0.015625, %v224_v35  ;;  %v292_v60 = vmul.f32 %v1651_v28, %v1651_v28  ;;  %v1273_v35 = vpack.c.bf16 %v464_v55, %v463_v49 }
 0x17b   :  { %v227_v62 = vpop.xlane.xlu1 %226  ;;  %v316_v45 = vsel %vm209_vm1, %v294_v33, 0.0 }
 0x17c   :  { %v1662_v36 = vsub.f32 %v197_v51, %v263_v58  ;;  %v264_v37 = vmul.f32 0.015625, %v227_v62  ;;  %v310_v63 = vsel %vm209_vm1, %v292_v60, 0.0  ;;  %1274 = vmatprep.subr.bf16.mxu1 %v1273_v35 }
 0x17d   :  { %314 = vadd.xlane.f32.xlu0 %v313_v39  ;;  %311 = vadd.xlane.f32.xlu1 %v310_v63  ;;  %v230_v1 = vpop.xlane.xlu0 %229 }
 0x17e   :  { %v1668_v7 = vsub.f32 %v198_v54, %v264_v37  ;;  %v265_v8 = vmul.f32 0.015625, %v230_v1  ;;  %v295_v9 = vmul.f32 %v1662_v36, %v1662_v36  ;;  %1276 = vmatpush3.bf16.msra.mxu1 %v1273_v35 }
 0x17f   :  { %v233_v10 = vpop.xlane.xlu1 %232 }
 0x180   :  { %v1675_v51 = vsub.f32 %v199_v50, %v265_v8  ;;  %v266_v12 = vmul.f32 0.015625, %v233_v10  ;;  %v319_v14 = vsel %vm209_vm1, %v295_v9, 0.0  ;;  %v296_v15 = vmul.f32 %v1668_v7, %v1668_v7  ;;  %v465_v8 = vld [vmem:[%s2178_s3 + $0x20] sm:$0xff]  ;;  %v467_v10 = vld [vmem:[%s2178_s3 + $0x30] sm:$0xff] }
 0x181   :  { %317 = vadd.xlane.f32.xlu1 %v316_v45  ;;  %320 = vadd.xlane.f32.xlu0 %v319_v14  ;;  %v236_v52 = vpop.xlane.xlu0 %235  ;;  %v468_v45 = vld [vmem:[%s2178_s3 + $0x38] sm:$0xff] }
 0x182   :  { %v1682_v54 = vsub.f32 %v200_v53, %v266_v12  ;;  %v267_v17 = vmul.f32 0.015625, %v236_v52  ;;  %v297_v23 = vmul.f32 %v1675_v51, %v1675_v51  ;;  %v322_v50 = vsel %vm209_vm1, %v296_v15, 0.0 }
 0x183   :  { %v239_v42 = vpop.xlane.xlu1 %238  ;;  %v1281_v12 = vpack.c.bf16 %v468_v45, %v467_v10 }
 0x184   :  { %v1689_v24 = vsub.f32 %v201_v3, %v267_v17  ;;  %v268_v25 = vmul.f32 0.015625, %v239_v42  ;;  %v325_v26 = vsel %vm209_vm1, %v297_v23, 0.0  ;;  %v298_v27 = vmul.f32 %v1682_v54, %v1682_v54 }
 0x185   :  { %323 = vadd.xlane.f32.xlu1 %v322_v50  ;;  %326 = vadd.xlane.f32.xlu0 %v325_v26  ;;  %v242_v48 = vpop.xlane.xlu0 %241 }
 0x186   :  { %v1696_v53 = vsub.f32 %v202_v6, %v268_v25  ;;  %v269_v29 = vmul.f32 0.015625, %v242_v48  ;;  %v299_v31 = vmul.f32 %v1689_v24, %v1689_v24  ;;  %v328_v3 = vsel %vm209_vm1, %v298_v27, 0.0 }
 0x187   :  { %v245_v61 = vpop.xlane.xlu1 %244 }
 0x188   :  { %v1703_v34 = vsub.f32 %v203_v2, %v269_v29  ;;  %v270_v38 = vmul.f32 0.015625, %v245_v61  ;;  %v331_v40 = vsel %vm209_vm1, %v299_v31, 0.0  ;;  %v300_v41 = vmul.f32 %v1696_v53, %v1696_v53 }
 0x189   :  { %329 = vadd.xlane.f32.xlu1 %v328_v3  ;;  %332 = vadd.xlane.f32.xlu0 %v331_v40  ;;  %v248_v4 = vpop.xlane.xlu0 %247 }
 0x18a   :  { %v1710_v6 = vsub.f32 %v204_v5, %v270_v38  ;;  %v271_v46 = vmul.f32 0.015625, %v248_v4  ;;  %v301_v47 = vmul.f32 %v1703_v34, %v1703_v34  ;;  %v334_v2 = vsel %vm209_vm1, %v300_v41, 0.0 }
 0x18b   :  { %v251_v59 = vpop.xlane.xlu1 %250 }
 0x18c   :  { %v1723_v0 = vsub.f32 %v205_v19, %v271_v46  ;;  %v272_v5 = vmul.f32 0.015625, %v251_v59  ;;  %v337_v56 = vsel %vm209_vm1, %v301_v47, 0.0  ;;  %v302_v32 = vmul.f32 %v1710_v6, %v1710_v6  ;;  %v1768_v47 = vld [vmem:[%s2177_s2 + $0x1] ss:$0 sm:$0xff] }
 0x18d   :  { %335 = vadd.xlane.f32.xlu1 %v334_v2  ;;  %338 = vadd.xlane.f32.xlu0 %v337_v56  ;;  %v254_v30 = vpop.xlane.xlu0 %253  ;;  %v1774_v56 = vld [vmem:[%s2177_s2 + $0x2] ss:$0 sm:$0xff] }
 0x18e   :  { %v1730_v58 = vsub.f32 %v206_v22, %v272_v5  ;;  %v273_v60 = vmul.f32 0.015625, %v254_v30  ;;  %v303_v13 = vmul.f32 %v1723_v0, %v1723_v0  ;;  %v340_v62 = vsel %vm209_vm1, %v302_v32, 0.0 }
 0x18f   :  { %v257_v19 = vpop.xlane.xlu1 %256 }
 0x190   :  { %v1737_v33 = vsub.f32 %v207_v18, %v273_v60  ;;  %v274_v37 = vmul.f32 0.015625, %v257_v19  ;;  %v343_v39 = vsel %vm209_vm1, %v303_v13, 0.0  ;;  %v304_v20 = vmul.f32 %v1730_v58, %v1730_v58 }
 0x191   :  { %341 = vadd.xlane.f32.xlu1 %v340_v62  ;;  %344 = vadd.xlane.f32.xlu0 %v343_v39 }
 0x192   :  { %v1744_v22 = vsub.f32 %v208_v21, %v274_v37  ;;  %v305_v63 = vmul.f32 %v1737_v33, %v1737_v33  ;;  %v346_v11 = vsel %vm209_vm1, %v304_v20, 0.0  ;;  %v1277_v21 = vpack.c.bf16 %v466_v16, %v465_v8 }
 0x194   :  { %v349_v18 = vsel %vm209_vm1, %v305_v63, 0.0  ;;  %v306_v1 = vmul.f32 %v1744_v22, %v1744_v22  ;;  %1278 = vmatprep.subr.bf16.mxu1 %v1277_v21 }
 0x195   :  { %347 = vadd.xlane.f32.xlu1 %v346_v11  ;;  %350 = vadd.xlane.f32.xlu0 %v349_v18 }
 0x196   :  { %v352_v9 = vsel %vm209_vm1, %v306_v1, 0.0  ;;  %1280 = vmatpush3.bf16.msra.mxu1 %v1277_v21 }
 0x197   :  { %1282 = vmatprep.subr.bf16.mxu1 %v1281_v12 }
 0x199   :  { %353 = vadd.xlane.f32.xlu1 %v352_v9 }
 0x19a   :  { %1284 = vmatpush3.bf16.msra.mxu1 %v1281_v12 }
 0x206   :  { %v309_v14 = vpop.xlane.xlu0 %308 }
 0x207   :  { %v355_v15 = vmul.f32 0.015625, %v309_v14 }
 0x209   :  { %v371_v52 = vadd.f32 1e-05, %v355_v15 }
 0x20a   :  { %v312_v17 = vpop.xlane.xlu1 %311  ;;  %v315_v23 = vpop.xlane.xlu0 %314 }
 0x20b   :  { %1323 = vrsqrt.f32 %v371_v52  ;;  %v356_v42 = vmul.f32 0.015625, %v312_v17  ;;  %v357_v50 = vmul.f32 0.015625, %v315_v23 }
 0x20d   :  { %v372_v25 = vadd.f32 1e-05, %v356_v42  ;;  %v373_v26 = vadd.f32 1e-05, %v357_v50 }
 0x20e   :  { %v318_v27 = vpop.xlane.xlu1 %317  ;;  %v321_v48 = vpop.xlane.xlu0 %320 }
 0x20f   :  { %1325 = vrsqrt.f32 %v372_v25  ;;  %v358_v29 = vmul.f32 0.015625, %v318_v27  ;;  %v359_v31 = vmul.f32 0.015625, %v321_v48 }
 0x210   :  { %1327 = vrsqrt.f32 %v373_v26 }
 0x211   :  { %v374_v61 = vadd.f32 1e-05, %v358_v29  ;;  %v375_v3 = vadd.f32 1e-05, %v359_v31 }
 0x212   :  { %v324_v38 = vpop.xlane.xlu1 %323  ;;  %v327_v40 = vpop.xlane.xlu0 %326 }
 0x213   :  { %1329 = vrsqrt.f32 %v374_v61  ;;  %v360_v41 = vmul.f32 0.015625, %v324_v38  ;;  %v361_v4 = vmul.f32 0.015625, %v327_v40 }
 0x214   :  { %1331 = vrsqrt.f32 %v375_v3 }
 0x215   :  { %v1324_v46 = vpop.eup %1323  ;;  %v376_v59 = vadd.f32 1e-05, %v360_v41  ;;  %v377_v2 = vadd.f32 1e-05, %v361_v4 }
 0x216   :  { %v330_v49 = vpop.xlane.xlu1 %329  ;;  %v333_v55 = vpop.xlane.xlu0 %332  ;;  %v403_v5 = vmul.f32 %v1324_v46, %v1641_v44 }
 0x217   :  { %1333 = vrsqrt.f32 %v376_v59  ;;  %v362_v32 = vmul.f32 0.015625, %v330_v49  ;;  %v363_v30 = vmul.f32 0.015625, %v333_v55 }
 0x218   :  { %1335 = vrsqrt.f32 %v377_v2  ;;  %v424_v35 = vmul.f32 %v1768_v47, %v403_v5 }
 0x219   :  { %v1326_v60 = vpop.eup %1325  ;;  %v378_v13 = vadd.f32 1e-05, %v362_v32  ;;  %v379_v19 = vadd.f32 1e-05, %v363_v30 }
 0x21a   :  { %v1328_v62 = vpop.eup %1327  ;;  %v404_v37 = vmul.f32 %v1326_v60, %v1651_v28  ;;  %v336_v39 = vpop.xlane.xlu1 %335  ;;  %v445_v44 = vadd.f32 %v1774_v56, %v424_v35 }
 0x21b   :  { %v339_v20 = vpop.xlane.xlu0 %338  ;;  %1337 = vrsqrt.f32 %v378_v13  ;;  %v364_v63 = vmul.f32 0.015625, %v336_v39  ;;  %v405_v18 = vmul.f32 %v1328_v62, %v1637_v43 }
 0x21c   :  { %v365_v11 = vmul.f32 0.015625, %v339_v20  ;;  %v425_v1 = vmul.f32 %v1768_v47, %v404_v37  ;;  %1339 = vrsqrt.f32 %v379_v19  ;;  %1210 = vmatprep.mubr.msk.f32.mxu1 %vm209_vm1, %v445_v44 }
 0x21d   :  { %v1330_v8 = vpop.eup %1329  ;;  %v380_v16 = vadd.f32 1e-05, %v364_v63  ;;  %v426_v9 = vmul.f32 %v1768_v47, %v405_v18 }
 0x21e   :  { %v381_v21 = vadd.f32 1e-05, %v365_v11  ;;  %v1332_v28 = vpop.eup %1331  ;;  %v446_v10 = vadd.f32 %v1774_v56, %v425_v1  ;;  %v342_v45 = vpop.xlane.xlu1 %341  ;;  %v406_v14 = vmul.f32 %v1330_v8, %v1647_v57 }
 0x21f   :  { %v345_v12 = vpop.xlane.xlu0 %344  ;;  %1341 = vrsqrt.f32 %v380_v16  ;;  %v366_v15 = vmul.f32 0.015625, %v342_v45  ;;  %v447_v52 = vadd.f32 %v1774_v56, %v426_v9  ;;  %v407_v23 = vmul.f32 %v1332_v28, %v1662_v36 }
 0x220   :  { %v367_v43 = vmul.f32 0.015625, %v345_v12  ;;  %1343 = vrsqrt.f32 %v381_v21  ;;  %1211 = vmatmul.mubr.msk.f32.vlgmr.msra.gmra.mrb[16].mxu1 %vm209_vm1, %v446_v10  ;;  %v427_v17 = vmul.f32 %v1768_v47, %v406_v14 }
 0x221   :  { %v1334_v42 = vpop.eup %1333  ;;  %v382_v50 = vadd.f32 1e-05, %v366_v15  ;;  %1213 = vmatprep.mubr.msk.f32.mxu1 %vm209_vm1, %v447_v52  ;;  %v428_v29 = vmul.f32 %v1768_v47, %v407_v23  ;;  %v1842_v52 = vld [vmem:[%s2179_s4] ss:$0 sm:$0xff] }
 0x222   :  { %v383_v25 = vadd.f32 1e-05, %v367_v43  ;;  %v1336_v26 = vpop.eup %1335  ;;  %v348_v27 = vpop.xlane.xlu1 %347  ;;  %v448_v48 = vadd.f32 %v1774_v56, %v427_v17  ;;  %v408_v31 = vmul.f32 %v1334_v42, %v1668_v7 }
 0x223   :  { %v351_v57 = vpop.xlane.xlu0 %350  ;;  %1345 = vrsqrt.f32 %v382_v50  ;;  %v368_v61 = vmul.f32 0.015625, %v348_v27  ;;  %v409_v38 = vmul.f32 %v1336_v26, %v1675_v51  ;;  %v449_v36 = vadd.f32 %v1774_v56, %v428_v29 }
 0x224   :  { %v369_v3 = vmul.f32 0.015625, %v351_v57  ;;  %1347 = vrsqrt.f32 %v383_v25  ;;  %1214 = vmatmul.mubr.msk.f32.gmra.mrb[18].mxu1 %vm209_vm1, %v448_v48  ;;  %v429_v40 = vmul.f32 %v1768_v47, %v408_v31 }
 0x225   :  { %v1338_v41 = vpop.eup %1337  ;;  %v384_v4 = vadd.f32 1e-05, %v368_v61  ;;  %v430_v59 = vmul.f32 %v1768_v47, %v409_v38  ;;  %1216 = vmatprep.mubr.msk.f32.mxu1 %vm209_vm1, %v449_v36 }
 0x226   :  { %v385_v46 = vadd.f32 1e-05, %v369_v3  ;;  %v1340_v2 = vpop.eup %1339  ;;  %v354_v7 = vpop.xlane.xlu1 %353  ;;  %v450_v49 = vadd.f32 %v1774_v56, %v429_v40  ;;  %v410_v51 = vmul.f32 %v1338_v41, %v1682_v54 }
 0x227   :  { %1349 = vrsqrt.f32 %v384_v4  ;;  %v370_v55 = vmul.f32 0.015625, %v354_v7  ;;  %v451_v5 = vadd.f32 %v1774_v56, %v430_v59  ;;  %v411_v32 = vmul.f32 %v1340_v2, %v1689_v24 }
 0x228   :  { %1351 = vrsqrt.f32 %v385_v46  ;;  %1217 = vmatmul.mubr.msk.f32.gmra.mrb[20].mxu1 %vm209_vm1, %v450_v49  ;;  %v431_v30 = vmul.f32 %v1768_v47, %v410_v51 }
 0x229   :  { %v1342_v35 = vpop.eup %1341  ;;  %v386_v60 = vadd.f32 1e-05, %v370_v55  ;;  %1219 = vmatprep.mubr.msk.f32.mxu1 %vm209_vm1, %v451_v5  ;;  %v432_v13 = vmul.f32 %v1768_v47, %v411_v32 }
 0x22a   :  { %v1344_v19 = vpop.eup %1343  ;;  %v452_v54 = vadd.f32 %v1774_v56, %v431_v30  ;;  %v412_v62 = vmul.f32 %v1342_v35, %v1696_v53 }
 0x22b   :  { %1353 = vrsqrt.f32 %v386_v60  ;;  %v453_v37 = vadd.f32 %v1774_v56, %v432_v13  ;;  %v413_v24 = vmul.f32 %v1344_v19, %v1703_v34 }
 0x22c   :  { %1220 = vmatmul.mubr.msk.f32.gmra.mrb[22].mxu1 %vm209_vm1, %v452_v54  ;;  %v433_v39 = vmul.f32 %v1768_v47, %v412_v62 }
 0x22d   :  { %v1346_v20 = vpop.eup %1345  ;;  %1222 = vmatprep.mubr.msk.f32.mxu1 %vm209_vm1, %v453_v37  ;;  %v434_v44 = vmul.f32 %v1768_v47, %v413_v24 }
 0x22e   :  { %v1348_v63 = vpop.eup %1347  ;;  %v454_v11 = vadd.f32 %v1774_v56, %v433_v39  ;;  %v414_v18 = vmul.f32 %v1346_v20, %v1710_v6 }
 0x22f   :  { %v455_v53 = vadd.f32 %v1774_v56, %v434_v44  ;;  %v415_v1 = vmul.f32 %v1348_v63, %v1723_v0 }
 0x230   :  { %1223 = vmatmul.mubr.msk.f32.gmra.mrb[24].mxu1 %vm209_vm1, %v454_v11  ;;  %v435_v34 = vmul.f32 %v1768_v47, %v414_v18 }
 0x231   :  { %v1350_v8 = vpop.eup %1349  ;;  %1225 = vmatprep.mubr.msk.f32.mxu1 %vm209_vm1, %v455_v53  ;;  %v436_v16 = vmul.f32 %v1768_v47, %v415_v1 }
 0x232   :  { %v1352_v21 = vpop.eup %1351  ;;  %v456_v9 = vadd.f32 %v1774_v56, %v435_v34  ;;  %v416_v28 = vmul.f32 %v1350_v8, %v1730_v58 }
 0x233   :  { %v457_v6 = vadd.f32 %v1774_v56, %v436_v16  ;;  %v417_v10 = vmul.f32 %v1352_v21, %v1737_v33 }
 0x234   :  { %1226 = vmatmul.mubr.msk.f32.gmra.mrb[26].mxu1 %vm209_vm1, %v456_v9  ;;  %v437_v0 = vmul.f32 %v1768_v47, %v416_v28 }
 0x235   :  { %v1354_v45 = vpop.eup %1353  ;;  %1228 = vmatprep.mubr.msk.f32.mxu1 %vm209_vm1, %v457_v6  ;;  %v438_v12 = vmul.f32 %v1768_v47, %v417_v10 }
 0x236   :  { %v458_v14 = vadd.f32 %v1774_v56, %v437_v0  ;;  %v418_v15 = vmul.f32 %v1354_v45, %v1744_v22 }
 0x237   :  { %v459_v43 = vadd.f32 %v1774_v56, %v438_v12 }
 0x238   :  { %1229 = vmatmul.mubr.msk.f32.gmra.mrb[28].mxu1 %vm209_vm1, %v458_v14  ;;  %v439_v58 = vmul.f32 %v1768_v47, %v418_v15 }
 0x239   :  { %1231 = vmatprep.mubr.msk.f32.mxu1 %vm209_vm1, %v459_v43 }
 0x23a   :  { %v460_v33 = vadd.f32 %v1774_v56, %v439_v58 }
 0x23c   :  { %1232 = vmatmul.mubr.msk.f32.gmra.mrb[30].mxu1 %vm209_vm1, %v460_v33 }
 0x2f3   :  { %v1212_v17 = vpop.f32.mrb[16].mxu1 }
 0x2f4   :  { %v1845_v22 = vadd.f32 %v1212_v17, %v1842_v52  ;;  %v588_v23 = vpop.f32.mrb[17].mxu1 }
 0x2f5   :  { %v1848_v42 = vadd.f32 %v1842_v52, %v588_v23 }
 0x2f6   :  { %v668_v47 = vmax.f32 %v1845_v22, 0.0 }
 0x2f7   :  { %v667_v50 = vmax.f32 %v1848_v42, 0.0  ;;  %v1215_v56 = vpop.f32.mrb[18].mxu1 }
 0x2f8   :  { %v1853_v25 = vadd.f32 %v1215_v56, %v1842_v52  ;;  %v598_v26 = vpop.f32.mrb[19].mxu1  ;;  %v686_v27 = vsel %vm71_vm0, %v668_v47, 0.0 }
 0x2f9   :  { %v1859_v57 = vadd.f32 %v1842_v52, %v598_v26  ;;  %687 = vadd.xlane.f32.xlu1 %v686_v27  ;;  %v683_v48 = vsel %vm71_vm0, %v667_v50, 0.0 }
 0x2fa   :  { %v670_v29 = vmax.f32 %v1853_v25, 0.0  ;;  %684 = vadd.xlane.f32.xlu0 %v683_v48 }
 0x2fb   :  { %v669_v31 = vmax.f32 %v1859_v57, 0.0  ;;  %v1218_v61 = vpop.f32.mrb[20].mxu1 }
 0x2fc   :  { %v1867_v3 = vadd.f32 %v1218_v61, %v1842_v52  ;;  %v608_v38 = vpop.f32.mrb[21].mxu1  ;;  %v692_v36 = vsel %vm71_vm0, %v670_v29, 0.0 }
 0x2fd   :  { %v1873_v40 = vadd.f32 %v1842_v52, %v608_v38  ;;  %693 = vadd.xlane.f32.xlu1 %v692_v36  ;;  %v689_v41 = vsel %vm71_vm0, %v669_v31, 0.0 }
 0x2fe   :  { %v672_v4 = vmax.f32 %v1867_v3, 0.0  ;;  %690 = vadd.xlane.f32.xlu0 %v689_v41 }
 0x2ff   :  { %v671_v46 = vmax.f32 %v1873_v40, 0.0  ;;  %v1221_v59 = vpop.f32.mrb[22].mxu1 }
 0x300   :  { %v1881_v2 = vadd.f32 %v1221_v59, %v1842_v52  ;;  %v618_v7 = vpop.f32.mrb[23].mxu1  ;;  %v698_v49 = vsel %vm71_vm0, %v672_v4, 0.0 }
 0x301   :  { %v1887_v51 = vadd.f32 %v1842_v52, %v618_v7  ;;  %699 = vadd.xlane.f32.xlu1 %v698_v49  ;;  %v695_v55 = vsel %vm71_vm0, %v671_v46, 0.0 }
 0x302   :  { %v674_v5 = vmax.f32 %v1881_v2, 0.0  ;;  %696 = vadd.xlane.f32.xlu0 %v695_v55 }
 0x303   :  { %v673_v32 = vmax.f32 %v1887_v51, 0.0  ;;  %v1224_v30 = vpop.f32.mrb[24].mxu1 }
 0x304   :  { %v1895_v35 = vadd.f32 %v1224_v30, %v1842_v52  ;;  %v628_v60 = vpop.f32.mrb[25].mxu1  ;;  %v704_v13 = vsel %vm71_vm0, %v674_v5, 0.0 }
 0x305   :  { %v1901_v19 = vadd.f32 %v1842_v52, %v628_v60  ;;  %705 = vadd.xlane.f32.xlu1 %v704_v13  ;;  %v701_v54 = vsel %vm71_vm0, %v673_v32, 0.0 }
 0x306   :  { %v676_v62 = vmax.f32 %v1895_v35, 0.0  ;;  %702 = vadd.xlane.f32.xlu0 %v701_v54 }
 0x307   :  { %v675_v37 = vmax.f32 %v1901_v19, 0.0  ;;  %v1227_v24 = vpop.f32.mrb[26].mxu1 }
 0x308   :  { %v1909_v39 = vadd.f32 %v1227_v24, %v1842_v52  ;;  %v638_v20 = vpop.f32.mrb[27].mxu1  ;;  %v710_v44 = vsel %vm71_vm0, %v676_v62, 0.0 }
 0x309   :  { %v1915_v63 = vadd.f32 %v1842_v52, %v638_v20  ;;  %711 = vadd.xlane.f32.xlu1 %v710_v44  ;;  %v707_v11 = vsel %vm71_vm0, %v675_v37, 0.0 }
 0x30a   :  { %v678_v18 = vmax.f32 %v1909_v39, 0.0  ;;  %708 = vadd.xlane.f32.xlu0 %v707_v11 }
 0x30b   :  { %v677_v53 = vmax.f32 %v1915_v63, 0.0  ;;  %v1230_v1 = vpop.f32.mrb[28].mxu1 }
 0x30c   :  { %v1923_v34 = vadd.f32 %v1230_v1, %v1842_v52  ;;  %v648_v8 = vpop.f32.mrb[29].mxu1  ;;  %v716_v16 = vsel %vm71_vm0, %v678_v18, 0.0 }
 0x30d   :  { %v1929_v21 = vadd.f32 %v1842_v52, %v648_v8  ;;  %717 = vadd.xlane.f32.xlu1 %v716_v16  ;;  %v713_v9 = vsel %vm71_vm0, %v677_v53, 0.0 }
 0x30e   :  { %v680_v28 = vmax.f32 %v1923_v34, 0.0  ;;  %714 = vadd.xlane.f32.xlu0 %v713_v9 }
 0x30f   :  { %v679_v6 = vmax.f32 %v1929_v21, 0.0  ;;  %v1233_v10 = vpop.f32.mrb[30].mxu1 }
 0x310   :  { %v1937_v0 = vadd.f32 %v1233_v10, %v1842_v52  ;;  %v658_v45 = vpop.f32.mrb[31].mxu1  ;;  %v722_v12 = vsel %vm71_vm0, %v680_v28, 0.0 }
 0x311   :  { %v1943_v14 = vadd.f32 %v1842_v52, %v658_v45  ;;  %723 = vadd.xlane.f32.xlu1 %v722_v12  ;;  %v719_v15 = vsel %vm71_vm0, %v679_v6, 0.0 }
 0x312   :  { %v682_v43 = vmax.f32 %v1937_v0, 0.0  ;;  %720 = vadd.xlane.f32.xlu0 %v719_v15 }
 0x313   :  { %v681_v58 = vmax.f32 %v1943_v14, 0.0  ;;  %v1413_v14 = vmov 0.0  }
 0x314   :  { %v728_v33 = vsel %vm71_vm0, %v682_v43, 0.0  ;;  %1266 = vmatprep.mubr.msk.f32.mxu0 %vm1412_vm2, %v1413_v14 }
 0x315   :  { %729 = vadd.xlane.f32.xlu1 %v728_v33  ;;  %v725_v52 = vsel %vm71_vm0, %v681_v58, 0.0 }
 0x316   :  { %726 = vadd.xlane.f32.xlu0 %v725_v52 }
 0x386   :  { %v688_v17 = vpop.xlane.xlu1 %687 }
 0x387   :  { %v733_v23 = vmul.f32 0.03125, %v688_v17  ;;  %v685_v56 = vpop.xlane.xlu0 %684 }
 0x388   :  { %v732_v26 = vmul.f32 0.03125, %v685_v56 }
 0x389   :  { %v1958_v27 = vsub.f32 %v668_v47, %v733_v23 }
 0x38a   :  { %v1962_v48 = vsub.f32 %v667_v50, %v732_v26  ;;  %v694_v61 = vpop.xlane.xlu1 %693 }
 0x38b   :  { %v735_v38 = vmul.f32 0.03125, %v694_v61  ;;  %v691_v36 = vpop.xlane.xlu0 %690  ;;  %v765_v41 = vmul.f32 %v1958_v27, %v1958_v27 }
 0x38c   :  { %v734_v59 = vmul.f32 0.03125, %v691_v36  ;;  %v764_v7 = vmul.f32 %v1962_v48, %v1962_v48 }
 0x38d   :  { %v1970_v49 = vsub.f32 %v670_v29, %v735_v38  ;;  %v783_v22 = vsel %vm71_vm0, %v765_v41, 0.0 }
 0x38e   :  { %v1975_v42 = vsub.f32 %v669_v31, %v734_v59  ;;  %v700_v47 = vpop.xlane.xlu1 %699  ;;  %784 = vadd.xlane.f32.xlu1 %v783_v22  ;;  %v780_v50 = vsel %vm71_vm0, %v764_v7, 0.0 }
 0x38f   :  { %v737_v55 = vmul.f32 0.03125, %v700_v47  ;;  %781 = vadd.xlane.f32.xlu0 %v780_v50  ;;  %v697_v30 = vpop.xlane.xlu0 %696  ;;  %v767_v60 = vmul.f32 %v1970_v49, %v1970_v49 }
 0x390   :  { %v736_v13 = vmul.f32 0.03125, %v697_v30  ;;  %v766_v25 = vmul.f32 %v1975_v42, %v1975_v42 }
 0x391   :  { %v1984_v29 = vsub.f32 %v672_v4, %v737_v55  ;;  %v789_v57 = vsel %vm71_vm0, %v767_v60, 0.0 }
 0x392   :  { %v1989_v31 = vsub.f32 %v671_v46, %v736_v13  ;;  %v706_v54 = vpop.xlane.xlu1 %705  ;;  %790 = vadd.xlane.f32.xlu1 %v789_v57  ;;  %v786_v24 = vsel %vm71_vm0, %v766_v25, 0.0  ;;  %v1411_v57 = vmov 0.0|0.0  }
 0x393   :  { %v739_v20 = vmul.f32 0.03125, %v706_v54  ;;  %787 = vadd.xlane.f32.xlu0 %v786_v24  ;;  %v703_v44 = vpop.xlane.xlu0 %702  ;;  %v769_v11 = vmul.f32 %v1984_v29, %v1984_v29  ;;  %1285 = vmatprep.subr.bf16.mxu0 %v1411_v57 }
 0x394   :  { %v738_v1 = vmul.f32 0.03125, %v703_v44  ;;  %v768_v3 = vmul.f32 %v1989_v31, %v1989_v31 }
 0x395   :  { %v1998_v4 = vsub.f32 %v674_v5, %v739_v20  ;;  %v795_v40 = vsel %vm71_vm0, %v769_v11, 0.0 }
 0x396   :  { %v2003_v46 = vsub.f32 %v673_v32, %v738_v1  ;;  %v712_v8 = vpop.xlane.xlu1 %711  ;;  %796 = vadd.xlane.f32.xlu1 %v795_v40  ;;  %v792_v16 = vsel %vm71_vm0, %v768_v3, 0.0 }
 0x397   :  { %v741_v9 = vmul.f32 0.03125, %v712_v8  ;;  %793 = vadd.xlane.f32.xlu0 %v792_v16  ;;  %v709_v10 = vpop.xlane.xlu0 %708  ;;  %v771_v45 = vmul.f32 %v1998_v4, %v1998_v4 }
 0x398   :  { %v740_v12 = vmul.f32 0.03125, %v709_v10  ;;  %v770_v2 = vmul.f32 %v2003_v46, %v2003_v46 }
 0x399   :  { %v2012_v5 = vsub.f32 %v676_v62, %v741_v9  ;;  %v801_v51 = vsel %vm71_vm0, %v771_v45, 0.0 }
 0x39a   :  { %v2017_v32 = vsub.f32 %v675_v37, %v740_v12  ;;  %v718_v15 = vpop.xlane.xlu1 %717  ;;  %802 = vadd.xlane.f32.xlu1 %v801_v51  ;;  %v798_v33 = vsel %vm71_vm0, %v770_v2, 0.0 }
 0x39b   :  { %v743_v52 = vmul.f32 0.03125, %v718_v15  ;;  %799 = vadd.xlane.f32.xlu0 %v798_v33  ;;  %v715_v17 = vpop.xlane.xlu0 %714  ;;  %v773_v23 = vmul.f32 %v2012_v5, %v2012_v5 }
 0x39c   :  { %v742_v56 = vmul.f32 0.03125, %v715_v17  ;;  %v772_v35 = vmul.f32 %v2017_v32, %v2017_v32 }
 0x39d   :  { %v2026_v62 = vsub.f32 %v678_v18, %v743_v52  ;;  %v807_v19 = vsel %vm71_vm0, %v773_v23, 0.0 }
 0x39e   :  { %v2031_v37 = vsub.f32 %v677_v53, %v742_v56  ;;  %v724_v26 = vpop.xlane.xlu1 %723  ;;  %808 = vadd.xlane.f32.xlu1 %v807_v19  ;;  %v804_v61 = vsel %vm71_vm0, %v772_v35, 0.0  ;;  %v2072_v35 = vld [vmem:[%s2179_s4 + $0x1] ss:$0 sm:$0xff] }
 0x39f   :  { %v745_v38 = vmul.f32 0.03125, %v724_v26  ;;  %805 = vadd.xlane.f32.xlu0 %v804_v61  ;;  %v721_v36 = vpop.xlane.xlu0 %720  ;;  %v775_v41 = vmul.f32 %v2026_v62, %v2026_v62 }
 0x3a0   :  { %v744_v59 = vmul.f32 0.03125, %v721_v36  ;;  %v774_v39 = vmul.f32 %v2031_v37, %v2031_v37  ;;  %v2079_v36 = vld [vmem:[%s2179_s4 + $0x2] ss:$0 sm:$0xff] }
 0x3a1   :  { %v2040_v18 = vsub.f32 %v680_v28, %v745_v38  ;;  %v813_v63 = vsel %vm71_vm0, %v775_v41, 0.0 }
 0x3a2   :  { %v2045_v53 = vsub.f32 %v679_v6, %v744_v59  ;;  %814 = vadd.xlane.f32.xlu1 %v813_v63  ;;  %v730_v7 = vpop.xlane.xlu1 %729  ;;  %v810_v22 = vsel %vm71_vm0, %v774_v39, 0.0 }
 0x3a3   :  { %v747_v47 = vmul.f32 0.03125, %v730_v7  ;;  %811 = vadd.xlane.f32.xlu0 %v810_v22  ;;  %v727_v50 = vpop.xlane.xlu0 %726  ;;  %v777_v55 = vmul.f32 %v2040_v18, %v2040_v18 }
 0x3a4   :  { %v746_v30 = vmul.f32 0.03125, %v727_v50  ;;  %v776_v34 = vmul.f32 %v2045_v53, %v2045_v53 }
 0x3a5   :  { %v2054_v28 = vsub.f32 %v682_v43, %v747_v47  ;;  %v819_v21 = vsel %vm71_vm0, %v777_v55, 0.0 }
 0x3a6   :  { %v2059_v6 = vsub.f32 %v681_v58, %v746_v30  ;;  %820 = vadd.xlane.f32.xlu1 %v819_v21  ;;  %v816_v60 = vsel %vm71_vm0, %v776_v34, 0.0 }
 0x3a7   :  { %817 = vadd.xlane.f32.xlu0 %v816_v60  ;;  %v779_v13 = vmul.f32 %v2054_v28, %v2054_v28 }
 0x3a8   :  { %v778_v25 = vmul.f32 %v2059_v6, %v2059_v6 }
 0x3a9   :  { %v825_v0 = vsel %vm71_vm0, %v779_v13, 0.0 }
 0x3aa   :  { %826 = vadd.xlane.f32.xlu1 %v825_v0  ;;  %v822_v43 = vsel %vm71_vm0, %v778_v25, 0.0 }
 0x3ab   :  { %823 = vadd.xlane.f32.xlu0 %v822_v43 }
 0x41b   :  { %v785_v58 = vpop.xlane.xlu1 %784 }
 0x41c   :  { %v829_v54 = vmul.f32 0.03125, %v785_v58  ;;  %v782_v24 = vpop.xlane.xlu0 %781 }
 0x41d   :  { %v828_v20 = vmul.f32 0.03125, %v782_v24 }
 0x41e   :  { %v845_v44 = vadd.f32 1e-05, %v829_v54 }
 0x41f   :  { %v844_v11 = vadd.f32 1e-05, %v828_v20  ;;  %v791_v1 = vpop.xlane.xlu1 %790 }
 0x420   :  { %1355 = vrsqrt.f32 %v845_v44  ;;  %v831_v3 = vmul.f32 0.03125, %v791_v1  ;;  %v788_v40 = vpop.xlane.xlu0 %787 }
 0x421   :  { %1357 = vrsqrt.f32 %v844_v11  ;;  %v830_v8 = vmul.f32 0.03125, %v788_v40 }
 0x422   :  { %v847_v16 = vadd.f32 1e-05, %v831_v3 }
 0x423   :  { %v846_v9 = vadd.f32 1e-05, %v830_v8  ;;  %v797_v10 = vpop.xlane.xlu1 %796 }
 0x424   :  { %1359 = vrsqrt.f32 %v847_v16  ;;  %v833_v45 = vmul.f32 0.03125, %v797_v10  ;;  %v794_v12 = vpop.xlane.xlu0 %793 }
 0x425   :  { %1361 = vrsqrt.f32 %v846_v9  ;;  %v832_v2 = vmul.f32 0.03125, %v794_v12 }
 0x426   :  { %v849_v51 = vadd.f32 1e-05, %v833_v45 }
 0x427   :  { %v848_v15 = vadd.f32 1e-05, %v832_v2  ;;  %v803_v33 = vpop.xlane.xlu1 %802 }
 0x428   :  { %1363 = vrsqrt.f32 %v849_v51  ;;  %v835_v52 = vmul.f32 0.03125, %v803_v33  ;;  %v800_v17 = vpop.xlane.xlu0 %799 }
 0x429   :  { %1365 = vrsqrt.f32 %v848_v15  ;;  %v834_v23 = vmul.f32 0.03125, %v800_v17 }
 0x42a   :  { %v1356_v56 = vpop.eup %1355  ;;  %v851_v61 = vadd.f32 1e-05, %v835_v52 }
 0x42b   :  { %v1358_v19 = vpop.eup %1357  ;;  %v877_v26 = vmul.f32 %v1356_v56, %v1958_v27  ;;  %v850_v41 = vadd.f32 1e-05, %v834_v23  ;;  %v809_v59 = vpop.xlane.xlu1 %808 }
 0x42c   :  { %v876_v38 = vmul.f32 %v1358_v19, %v1962_v48  ;;  %v806_v7 = vpop.xlane.xlu0 %805  ;;  %1367 = vrsqrt.f32 %v851_v61  ;;  %v837_v55 = vmul.f32 0.03125, %v809_v59 }
 0x42d   :  { %v898_v39 = vmul.f32 %v2072_v35, %v877_v26  ;;  %1369 = vrsqrt.f32 %v850_v41  ;;  %v836_v34 = vmul.f32 0.03125, %v806_v7 }
 0x42e   :  { %v1360_v63 = vpop.eup %1359  ;;  %v897_v22 = vmul.f32 %v2072_v35, %v876_v38 }
 0x42f   :  { %v1362_v47 = vpop.eup %1361  ;;  %v879_v50 = vmul.f32 %v1360_v63, %v1970_v49  ;;  %v919_v27 = vadd.f32 %v2079_v36, %v898_v39  ;;  %v852_v43 = vadd.f32 1e-05, %v836_v34  ;;  %v815_v14 = vpop.xlane.xlu1 %814 }
 0x430   :  { %v878_v48 = vmul.f32 %v1362_v47, %v1975_v42  ;;  %v918_v30 = vadd.f32 %v2079_v36, %v897_v22  ;;  %v853_v42 = vadd.f32 1e-05, %v837_v55  ;;  %v812_v24 = vpop.xlane.xlu0 %811  ;;  %v839_v11 = vmul.f32 0.03125, %v815_v14 }
 0x431   :  { %v900_v25 = vmul.f32 %v2072_v35, %v879_v50  ;;  %v838_v1 = vmul.f32 0.03125, %v812_v24 }
 0x432   :  { %v1364_v60 = vpop.eup %1363  ;;  %v1286_v13 = vpack.c.bf16 %v919_v27, %v918_v30  ;;  %v899_v49 = vmul.f32 %v2072_v35, %v878_v48  ;;  %1371 = vrsqrt.f32 %v853_v42  ;;  %v855_v10 = vadd.f32 1e-05, %v839_v11 }
 0x433   :  { %v1366_v0 = vpop.eup %1365  ;;  %v881_v58 = vmul.f32 %v1364_v60, %v1984_v29  ;;  %v921_v44 = vadd.f32 %v2079_v36, %v900_v25  ;;  %1373 = vrsqrt.f32 %v852_v43  ;;  %v854_v29 = vadd.f32 1e-05, %v838_v1 }
 0x434   :  { %1288 = vmatpush3.bf16.xpose.msk.msra.mxu0 %vm2089_vm3, %v1286_v13  ;;  %v880_v54 = vmul.f32 %v1366_v0, %v1989_v31  ;;  %v920_v20 = vadd.f32 %v2079_v36, %v899_v49  ;;  %v821_v31 = vpop.xlane.xlu1 %820  ;;  %v818_v2 = vpop.xlane.xlu0 %817  ;;  %1375 = vrsqrt.f32 %v855_v10 }
 0x435   :  { %1289 = vmatprep.subr.bf16.mxu0 %v1411_v57  ;;  %v902_v16 = vmul.f32 %v2072_v35, %v881_v58  ;;  %v841_v33 = vmul.f32 0.03125, %v821_v31  ;;  %1377 = vrsqrt.f32 %v854_v29  ;;  %v840_v52 = vmul.f32 0.03125, %v818_v2 }
 0x436   :  { %v1368_v3 = vpop.eup %1367  ;;  %v1290_v40 = vpack.c.bf16 %v921_v44, %v920_v20  ;;  %v901_v8 = vmul.f32 %v2072_v35, %v880_v54 }
 0x437   :  { %v1370_v9 = vpop.eup %1369  ;;  %v883_v45 = vmul.f32 %v1368_v3, %v1998_v4  ;;  %v923_v15 = vadd.f32 %v2079_v36, %v902_v16  ;;  %v857_v61 = vadd.f32 1e-05, %v841_v33  ;;  %v856_v4 = vadd.f32 1e-05, %v840_v52 }
 0x438   :  { %v882_v12 = vmul.f32 %v1370_v9, %v2003_v46  ;;  %v922_v51 = vadd.f32 %v2079_v36, %v901_v8  ;;  %v827_v46 = vpop.xlane.xlu1 %826  ;;  %v824_v59 = vpop.xlane.xlu0 %823 }
 0x439   :  { %v904_v19 = vmul.f32 %v2072_v35, %v883_v45  ;;  %1379 = vrsqrt.f32 %v857_v61  ;;  %v843_v7 = vmul.f32 0.03125, %v827_v46  ;;  %v842_v22 = vmul.f32 0.03125, %v824_v59 }
 0x43a   :  { %v1294_v23 = vpack.c.bf16 %v923_v15, %v922_v51  ;;  %v903_v56 = vmul.f32 %v2072_v35, %v882_v12  ;;  %1381 = vrsqrt.f32 %v856_v4 }
 0x43b   :  { %v925_v63 = vadd.f32 %v2079_v36, %v904_v19  ;;  %v859_v30 = vadd.f32 1e-05, %v843_v7 }
 0x43c   :  { %1292 = vmatpush3.bf16.xpose.msk.msra.mxu0 %vm2089_vm3, %v1290_v40  ;;  %v1372_v17 = vpop.eup %1371  ;;  %v924_v39 = vadd.f32 %v2079_v36, %v903_v56 }
 0x43d   :  { %1293 = vmatprep.subr.bf16.mxu0 %v1411_v57  ;;  %v1374_v26 = vpop.eup %1373  ;;  %v885_v38 = vmul.f32 %v1372_v17, %v2012_v5  ;;  %v858_v5 = vadd.f32 1e-05, %v842_v22  ;;  %1383 = vrsqrt.f32 %v859_v30 }
 0x43e   :  { %v884_v41 = vmul.f32 %v1374_v26, %v2017_v32  ;;  %v1376_v47 = vpop.eup %1375  ;;  %v1298_v50 = vpack.c.bf16 %v925_v63, %v924_v39 }
 0x43f   :  { %v906_v48 = vmul.f32 %v2072_v35, %v885_v38  ;;  %v1378_v55 = vpop.eup %1377  ;;  %v887_v32 = vmul.f32 %v1376_v47, %v2026_v62  ;;  %1385 = vrsqrt.f32 %v858_v5 }
 0x440   :  { %v905_v27 = vmul.f32 %v2072_v35, %v884_v41  ;;  %v886_v34 = vmul.f32 %v1378_v55, %v2031_v37 }
 0x441   :  { %v927_v13 = vadd.f32 %v2079_v36, %v906_v48  ;;  %v908_v42 = vmul.f32 %v2072_v35, %v887_v32 }
 0x442   :  { %v926_v60 = vadd.f32 %v2079_v36, %v905_v27  ;;  %v907_v0 = vmul.f32 %v2072_v35, %v886_v34 }
 0x443   :  { %v1380_v49 = vpop.eup %1379  ;;  %v929_v58 = vadd.f32 %v2079_v36, %v908_v42 }
 0x444   :  { %1296 = vmatpush3.bf16.xpose.msk.msra.mxu0 %vm2089_vm3, %v1294_v23  ;;  %v1302_v25 = vpack.c.bf16 %v927_v13, %v926_v60  ;;  %v1382_v43 = vpop.eup %1381  ;;  %v889_v62 = vmul.f32 %v1380_v49, %v2040_v18  ;;  %v928_v14 = vadd.f32 %v2079_v36, %v907_v0 }
 0x445   :  { %1297 = vmatprep.subr.bf16.mxu0 %v1411_v57  ;;  %v888_v37 = vmul.f32 %v1382_v43, %v2045_v53 }
 0x446   :  { %v1306_v24 = vpack.c.bf16 %v929_v58, %v928_v14  ;;  %v910_v44 = vmul.f32 %v2072_v35, %v889_v62 }
 0x447   :  { %v1384_v54 = vpop.eup %1383  ;;  %v909_v20 = vmul.f32 %v2072_v35, %v888_v37 }
 0x448   :  { %v891_v18 = vmul.f32 %v1384_v54, %v2054_v28  ;;  %v931_v3 = vadd.f32 %v2079_v36, %v910_v44 }
 0x449   :  { %v1386_v11 = vpop.eup %1385  ;;  %v930_v1 = vadd.f32 %v2079_v36, %v909_v20 }
 0x44a   :  { %v890_v53 = vmul.f32 %v1386_v11, %v2059_v6  ;;  %v912_v16 = vmul.f32 %v2072_v35, %v891_v18  ;;  %v934_v6 = vld [vmem:[%s2179_s4 + $0x3] sm:$0x1] }
 0x44b   :  { %v1310_v40 = vpack.c.bf16 %v931_v3, %v930_v1 }
 0x44c   :  { %1300 = vmatpush3.bf16.xpose.msk.msra.mxu0 %vm2089_vm3, %v1298_v50  ;;  %v911_v8 = vmul.f32 %v2072_v35, %v890_v53  ;;  %v933_v28 = vadd.f32 %v2079_v36, %v912_v16  ;;  %v936_v35 = vstv %s2180_s5 }
 0x44d   :  { %1301 = vmatprep.subr.bf16.mxu0 %v1411_v57 }
 0x44e   :  { %v932_v9 = vadd.f32 %v2079_v36, %v911_v8 }
 0x450   :  { %v1314_v10 = vpack.c.bf16 %v933_v28, %v932_v9 }
 0x454   :  { %1304 = vmatpush3.bf16.xpose.msk.msra.mxu0 %vm2089_vm3, %v1302_v25 }
 0x455   :  { %1305 = vmatprep.subr.bf16.mxu0 %v1411_v57 }
 0x45c   :  { %1308 = vmatpush3.bf16.xpose.msk.msra.mxu0 %vm2089_vm3, %v1306_v24 }
 0x45d   :  { %1309 = vmatprep.subr.bf16.mxu0 %v1411_v57 }
 0x464   :  { %1312 = vmatpush3.bf16.xpose.msk.msra.mxu0 %vm2089_vm3, %v1310_v40 }
 0x465   :  { %1313 = vmatprep.subr.bf16.mxu0 %v1411_v57 }
 0x46c   :  { %1316 = vmatpush3.bf16.xpose.msk.msra.mxu0 %vm2089_vm3, %v1314_v10 }
 0x473   :  { %1267 = vmatmul.mubr.msk.f32.vlgmr.msra.gmra.mrb[0].mxu0 %vm71_vm0, %v934_v6 }
 0x546   :  { %v1054_v29 = vpop.f32.mrb[0].mxu0 }
 0x547   :  { %v1055_v57 = vadd.f32 %v1054_v29, %v936_v35  ;;  %v1268_v31 = vpop.f32.mrb[1].mxu0 }
 0x549   :  { %v1058_v36 = vmax.f32 %v1055_v57, 0.0 }
 0x54b   :  { %1059 = vst [vmem:[#allocation3] sm:$0x1] %v1058_v36 }
 0x54c   :  { %1398 = shalt.err (!%p1395_p4)
}
 0x54d   :  { %s1399_s5 = scalar_lea.hbm %s2181_s6, 16 }
 0x54e   :  { %p1400_p5 = scmp.ne.s32.totalorder %s2181_s6, %s1399_s5  ;;  %p1403_p6 = scmp.lt.u32.totalorder %s1399_s5, %s2181_s6 }
 0x550   :  { %p1405_p7 = pnand %p1403_p6, %p1400_p5 }
 0x552   :  { %1408 = shalt.err (!%p1405_p7)
}
 0x553   :  { %1069 = dma.vmem_to_hbm [thread:$0]  %s1067_s11, 16, %s2181_s6, [#allocation4]  }
 0x554   :  { %1409 = dma.done.wait [#allocation4], 16  }
 0x555   :  { %1410 = vsyncadd [#allocation4], 4294967280 }
 0x556   :  { %1073 = vsyncpa [#allocation4], 1 }

</bundles_post_ra>
